<compile_context>
chip_gen: v7x
topology: tpu7x:2x2x1
jax: 0.10.0
libtpu: 0.0.40
codegen_flags: <defaults>
</compile_context>

<pallas_src>
import functools
import math

import jax
import jax.numpy as jnp
from jax.experimental import pallas as pl
from jax.experimental.pallas import tpu as pltpu

LANE = 128
TARGET_BLOCK_BYTES = 2 * 1024 * 1024   # ~2 MiB per buffer (4096 f32 rows / 8192 bf16 rows)
SINGLE_BLOCK_BYTES = 128 * 1024        # below this, pipeline overhead dominates -> 1 block
MIN_GRID_STEPS = 4                     # >=2 shards per TC on v7x megacore + DMA overlap
VMEM_LIMIT_BYTES = 32 * 1024 * 1024    # safe on v5e (128 MiB), v6e (128 MiB), v7x (64 MiB/TC)


def _round_up(n, m):
    return ((n + m - 1) // m) * m


def _choose_block_rows(rows, itemsize):
    """Pick a block row-count: big DMAs, >=MIN_GRID_STEPS balanced blocks when large."""
    row_bytes = LANE * itemsize
    total_bytes = rows * row_bytes
    if total_bytes <= SINGLE_BLOCK_BYTES:
        return rows                                     # single full-array block
    cap_rows = max(8, TARGET_BLOCK_BYTES // row_bytes)  # dtype-aware cap
    block_rows = min(cap_rows, _round_up(pl.cdiv(rows, MIN_GRID_STEPS), 8))
    if block_rows >= rows:
        return rows
    return block_rows


def _lcq_kernel(clip_ref, x_ref, o_ref, *, num_bits, dequantize):
    # clip_ref is a scalar-prefetch SMEM ref of shape (1,)
    clip = clip_ref[0]
    n_levels = jnp.float32(2 ** num_bits - 1)
    scale = n_levels / clip                       # asymmetric_linear_quantization_params
    x = x_ref[...].astype(jnp.float32)
    clamped = jnp.clip(x, 0.0, clip)              # clamp(input, 0, clip_val)
    q = jnp.round(clamped * scale)                # linear_quantize (zero_point == 0)
    if dequantize:
        inv_scale = clip / n_levels               # scalar; broadcast mul, not vector divide
        q = q * inv_scale                         # linear_dequantize
    # NOTE: on a partial last block the padded rows compute on garbage values,
    # but those lanes are never stored (OOB writes dropped); harmless for this
    # purely elementwise op.
    o_ref[...] = q.astype(o_ref.dtype)


def _quantize_jnp(x, clip, num_bits, dequantize):
    """Same math as the kernel, for sub-128-element tails / degenerate tensors."""
    n_levels = jnp.float32(2 ** num_bits - 1)
    scale = n_levels / clip
    q = jnp.round(jnp.clip(x.astype(jnp.float32), 0.0, clip) * scale)
    if dequantize:
        q = q * (clip / n_levels)
    return q.astype(x.dtype)


def learned_clipped_linear_quantization(x, clip_val, *, num_bits, dequantize=True,
                                        inplace=False):
    """x: float array of any shape (e.g. NCHW). clip_val: scalar (must be > 0)."""
    orig_shape = x.shape
    orig_dtype = x.dtype
    total = math.prod(orig_shape)
    clip = jnp.asarray(clip_val, dtype=jnp.float32).reshape(())

    rem = total % LANE
    aligned = total - rem

    if aligned == 0:
        # Degenerate < 128-element tensor: the whole thing is "tail".
        return _quantize_jnp(x, clip, num_bits, dequantize)

    x_flat = x.reshape(-1)
    rows = aligned // LANE
    x2d = (x_flat.reshape(rows, LANE) if rem == 0
           else x_flat[:aligned].reshape(rows, LANE))

    itemsize = jnp.dtype(orig_dtype).itemsize
    block_rows = _choose_block_rows(rows, itemsize)
    grid = (pl.cdiv(rows, block_rows),)

    clip_arr = clip.reshape(1)
    kernel = functools.partial(_lcq_kernel, num_bits=num_bits, dequantize=dequantize)

    cost = pl.CostEstimate(
        flops=5 * aligned,                       # clamp(2) + mul + round + mul
        transcendentals=0,
        bytes_accessed=2 * aligned * itemsize,   # one read + one write
    )

    # x2d is input index 1 (index 0 is the scalar-prefetch clip array).
    io_aliases = {1: 0} if inplace else {}

    out2d = pl.pallas_call(
        kernel,
        out_shape=jax.ShapeDtypeStruct((rows, LANE), orig_dtype),
        grid_spec=pltpu.PrefetchScalarGridSpec(
            num_scalar_prefetch=1,
            grid=grid,
            in_specs=[pl.BlockSpec((block_rows, LANE), lambda i, clip_ref: (i, 0))],
            out_specs=pl.BlockSpec((block_rows, LANE), lambda i, clip_ref: (i, 0)),
        ),
        compiler_params=pltpu.CompilerParams(
            dimension_semantics=("parallel",),
            vmem_limit_bytes=VMEM_LIMIT_BYTES,
        ),
        cost_estimate=cost,
        input_output_aliases=io_aliases,
    )(clip_arr, x2d)

    if rem == 0:
        return out2d.reshape(orig_shape)

    # <=127-element tail epilogue (tiny), then stitch back together.
    tail = _quantize_jnp(x_flat[aligned:], clip, num_bits, dequantize)
    # TODO(synk): the concatenate is one extra HBM pass on ragged shapes; a fully
    # fused ragged path would need a donated output buffer or manual DMA.
    return jnp.concatenate([out2d.reshape(-1), tail]).reshape(orig_shape)


def _reference(x, clip_val, num_bits, dequantize=True):
    scale = (2 ** num_bits - 1) / clip_val
    out = jnp.clip(x, 0.0, clip_val)
    out = jnp.round(out * scale)
    if dequantize:
        out = out / scale
    return out


if __name__ == "__main__":
    # Module "parameters" (deterministic, in-script):
    num_bits = 4
    init_act_clip_val = 8.0          # nn.Parameter(torch.Tensor([8.0]))
    dequantize = True

    key = jax.random.PRNGKey(0)
    k0, k1, k2, k3 = jax.random.split(key, 4)

    # 1) Main NCHW activation: batch=2, channels=4, spatial=16x16
    #    (total % 128 == 0 -> pure reshape, single whole-array block).
    x = jax.random.normal(k0, (2, 4, 16, 16), dtype=jnp.float32) * 4.0 + 2.0
    out = learned_clipped_linear_quantization(
        x, init_act_clip_val, num_bits=num_bits, dequantize=dequantize
    )
    out = jax.block_until_ready(out)
    ref = _reference(x, init_act_clip_val, num_bits, dequantize)
    assert out.shape == x.shape and out.dtype == x.dtype
    # inv_scale multiply may differ from the true divide by <= 1 ULP.
    assert jnp.allclose(out, ref, atol=1e-5, rtol=1e-6), "mismatch vs reference (main)"

    # 1b) Same tensor through the input_output_aliases (inplace) path.
    out_ip = jax.block_until_ready(
        learned_clipped_linear_quantization(
            x, init_act_clip_val, num_bits=num_bits, dequantize=dequantize, inplace=True
        )
    )
    assert jnp.allclose(out_ip, ref, atol=1e-5, rtol=1e-6), "mismatch (inplace alias)"

    # 2a) Sub-128-element tensor: degenerate all-tail path (jnp epilogue only).
    x_tiny = jax.random.normal(k1, (3, 5, 7), dtype=jnp.float32) * 4.0 + 2.0
    out_tiny = jax.block_until_ready(
        learned_clipped_linear_quantization(
            x_tiny, init_act_clip_val, num_bits=num_bits, dequantize=dequantize
        )
    )
    ref_tiny = _reference(x_tiny, init_act_clip_val, num_bits, dequantize)
    assert jnp.allclose(out_tiny, ref_tiny, atol=1e-5, rtol=1e-6), "mismatch (tiny path)"

    # 2b) Unaligned shape exercising kernel-on-prefix + jnp tail stitching.
    x_odd = jax.random.normal(k2, (3, 7, 13), dtype=jnp.float32) * 4.0 + 2.0
    out_odd = jax.block_until_ready(
        learned_clipped_linear_quantization(
            x_odd, init_act_clip_val, num_bits=num_bits, dequantize=dequantize
        )
    )
    ref_odd = _reference(x_odd, init_act_clip_val, num_bits, dequantize)
    assert jnp.allclose(out_odd, ref_odd, atol=1e-5, rtol=1e-6), "mismatch (prefix+tail)"

    # 3) Larger activation exercises the multi-block path (>=4 grid steps so
    #    read/write DMAs overlap and v7x megacore can shard the grid).
    x_big = jax.random.normal(k3, (4, 32, 64, 64), dtype=jnp.float32) * 4.0 + 2.0
    out_big = jax.block_until_ready(
        learned_clipped_linear_quantization(
            x_big, init_act_clip_val, num_bits=num_bits, dequantize=dequantize
        )
    )
    ref_big = _reference(x_big, init_act_clip_val, num_bits, dequantize)
    assert jnp.allclose(out_big, ref_big, atol=1e-5, rtol=1e-6), "mismatch (multi-block)"

    print("KERNEL_OK")
</pallas_src>

<mosaic_0001>
module attributes {stable_mosaic.version = 11 : i64} {
  func.func @_lcq_kernel(%arg0: i32, %arg1: memref<1xf32, #tpu.memory_space<smem>>, %arg2: memref<16x128xf32, #tpu.memory_space<vmem>>, %arg3: memref<16x128xf32, #tpu.memory_space<vmem>>) attributes {dimension_semantics = [#tpu.dimension_semantics<parallel>], iteration_bounds = array<i64: 1>, scalar_prefetch = 1 : i64, scratch_operands = 0 : i64, tpu.core_type = #tpu.core_type<tc>, window_params = [{transform_indices = @transform_0, window_bounds = array<i64: 16, 128>}, {transform_indices = @transform_1, window_bounds = array<i64: 16, 128>}]} {
    %c0 = arith.constant 0 : index
    %0 = memref.load %arg1[%c0] : memref<1xf32, #tpu.memory_space<smem>>
    %cst = arith.constant 1.500000e+01 : f32
    %1 = arith.divf %cst, %0 : f32
    %c0_0 = arith.constant 0 : index
    %c0_1 = arith.constant 0 : index
    %2 = vector.load %arg2[%c0_0, %c0_1] : memref<16x128xf32, #tpu.memory_space<vmem>>, vector<16x128xf32>
    %cst_2 = arith.constant 0.000000e+00 : f32
    %3 = vector.broadcast %cst_2 : f32 to vector<16x128xf32>
    %4 = arith.maximumf %3, %2 : vector<16x128xf32>
    %5 = vector.broadcast %0 : f32 to vector<16x128xf32>
    %6 = arith.minimumf %5, %4 : vector<16x128xf32>
    %7 = vector.broadcast %1 : f32 to vector<16x128xf32>
    %8 = arith.mulf %6, %7 : vector<16x128xf32>
    %9 = math.roundeven %8 : vector<16x128xf32>
    %cst_3 = arith.constant 1.500000e+01 : f32
    %10 = arith.divf %0, %cst_3 : f32
    %11 = vector.broadcast %10 : f32 to vector<16x128xf32>
    %12 = arith.mulf %9, %11 : vector<16x128xf32>
    %c0_4 = arith.constant 0 : index
    %c0_5 = arith.constant 0 : index
    %13 = vector.load %arg3[%c0_4, %c0_5] : memref<16x128xf32, #tpu.memory_space<vmem>>, vector<16x128xf32>
    tpu.vector_store %arg3[%c0_4, %c0_5], %12 {strides = array<i32>} : memref<16x128xf32, #tpu.memory_space<vmem>>, vector<16x128xf32>,
    return
  }
  func.func @transform_0(%arg0: i32, %arg1: memref<1xf32, #tpu.memory_space<smem>>) -> (i32, i32) {
    %c0_i32 = arith.constant 0 : i32
    %c0_i32_0 = arith.constant 0 : i32
    return %arg0, %c0_i32 : i32, i32
  }
  func.func @transform_1(%arg0: i32, %arg1: memref<1xf32, #tpu.memory_space<smem>>) -> (i32, i32) {
    %c0_i32 = arith.constant 0 : i32
    %c0_i32_0 = arith.constant 0 : i32
    return %arg0, %c0_i32 : i32, i32
  }
}

</mosaic_0001>

<bundles_post_ra>
// kernel: tpu_custom_call.1
= control target key start
LH: loop header
LB: loop body
LE: loop exit
PB: predicated region body
PF: predicated region fallthrough
CT: control target
= control target key end

     0   :  { %8 = vsyncpa [#allocation5], 0  ;;  %s180_s0 = inlined_call_operand.<no memory space> [shape: f32[1], index: 0, kind: input, shape index: {}]   ;;  %s181_s1 = inlined_call_operand.hbm [shape: f32[16,128], index: 1, kind: input, shape index: {}]   ;;  %s182_s2 = inlined_call_operand.hbm [shape: f32[16,128], index: 2, kind: output, shape index: {}]  }
   0x1   :  { %9 = vsyncpa [#allocation6], 0  ;;  %s125_s9 = smov [#allocation4]   ;;  %s77_s13 = scalar_lea.hbm %s181_s1, 256 }
   0x2   :  { %s15_s10 = sshll.u32 %s125_s9, 4  ;;  %p78_p0 = scmp.ne.s32.totalorder %s181_s1, %s77_s13  ;;  %s16_s10 = int_to_ptr.vmem [resolvable:$true] %s15_s10 }
   0x3   :  { %p81_p1 = scmp.lt.u32.totalorder %s77_s13, %s181_s1 }
   0x5   :  { %p83_p2 = pnand %p81_p1, %p78_p0 }
   0x7   :  { %86 = shalt.err (!%p83_p2)
}
   0x8   :  { %s87_s18 = scalar_lea.vmem %s16_s10, 256  ;;  %p92_p4 = scmp.lt.s32.totalorder %s16_s10, %s16_s10 }
   0x9   :  { %p88_p3 = scmp.ne.s32.totalorder %s16_s10, %s87_s18  ;;  %p93_p5 = scmp.lt.s32.totalorder %s87_s18, %s87_s18 }
   0xb   :  { %p94_p6 = por %p93_p5, %p92_p4 }
   0xd   :  { %p95_p7 = pnand %p94_p6, %p88_p3 }
   0xf   :  { %98 = shalt.err (!%p95_p7)
}
  0x10   :  { %s126_s19 = smov 128   ;;  %s127_s20 = smov 8   ;;  %v26_v0 = vstv %s180_s0 }
  0x11   :  { %21 = dma.hbm_to_vmem [thread:$0]  %s181_s1, 256, %s16_s10, [#allocation5], %s126_s19, %s126_s19, %s127_s20  }
  0x12   :  { %121 = dma.done.wait [#allocation5], 256  }
  0x13   :  { %122 = vsyncadd [#allocation5], 4294967040  ;;  %75 = vrcp.f32 %v26_v0  ;;  %v30_v2 = vld [vmem:[#allocation4] sm:$0xff]  ;;  %v31_v3 = vld [vmem:[#allocation4 + $0x8] sm:$0xff]  ;;  %s44_s1 = smul.f32 0.06666667, %s180_s0 }
  0x14   :  { %v32_v4 = vmax.f32 %v30_v2, 0.0  ;;  %v33_v5 = vmax.f32 %v31_v3, 0.0  ;;  %s128_s29 = smov [#allocation7]  }
  0x15   :  { %v45_v11 = vstv %s44_s1  ;;  %s55_s30 = sshll.u32 %s128_s29, 4  ;;  %s56_s30 = int_to_ptr.vmem [resolvable:$true] %s55_s30 }
  0x16   :  { %v35_v6 = vmin.f32 %v26_v0, %v32_v4  ;;  %v36_v7 = vmin.f32 %v26_v0, %v33_v5  ;;  %s99_s3 = scalar_lea.vmem %s56_s30, 256  ;;  %p104_p9 = scmp.lt.s32.totalorder %s56_s30, %s56_s30 }
  0x17   :  { %p100_p8 = scmp.ne.s32.totalorder %s56_s30, %s99_s3  ;;  %p105_p10 = scmp.lt.s32.totalorder %s99_s3, %s99_s3 }
  0x19   :  { %p106_p11 = por %p105_p10, %p104_p9 }
  0x1b   :  { %p107_p12 = pnand %p106_p11, %p100_p8 }
  0x1d   :  { %v76_v1 = vpop.eup %75 }
  0x1e   :  { %67 = vpush %v76_v1 }
  0x4f   :  { %s68_s25 = spop %67 }
  0x50   :  { %s29_s28 = smul.f32 15.0, %s68_s25 }
  0x52   :  { %v37_v8 = vstv %s29_s28 }
  0x53   :  { %v38_v9 = vmul.f32 %v37_v8, %v35_v6  ;;  %v39_v10 = vmul.f32 %v37_v8, %v36_v7 }
  0x55   :  { %v69_v12 = vround.rtne.f32 %v38_v9  ;;  %v70_v13 = vround.rtne.f32 %v39_v10 }
  0x57   :  { %v46_v14 = vmul.f32 %v69_v12, %v45_v11  ;;  %v47_v15 = vmul.f32 %v70_v13, %v45_v11 }
  0x59   :  { %48 = vst [vmem:[#allocation7] sm:$0xff] %v46_v14  ;;  %49 = vst [vmem:[#allocation7 + $0x8] sm:$0xff] %v47_v15 }
  0x5a   :  { %110 = shalt.err (!%p107_p12)
}
  0x5b   :  { %s111_s5 = scalar_lea.hbm %s182_s2, 256 }
  0x5c   :  { %p112_p13 = scmp.ne.s32.totalorder %s182_s2, %s111_s5  ;;  %p115_p0 = scmp.lt.u32.totalorder %s111_s5, %s182_s2 }
  0x5e   :  { %p117_p1 = pnand %p115_p0, %p112_p13 }
  0x60   :  { %120 = shalt.err (!%p117_p1)
}
  0x61   :  { %61 = dma.vmem_to_hbm [thread:$0]  %s56_s30, 256, %s182_s2, [#allocation6], %s126_s19, %s126_s19, %s127_s20  }
  0x62   :  { %123 = dma.done.wait [#allocation6], 256  }
  0x63   :  { %124 = vsyncadd [#allocation6], 4294967040 }
  0x64   :  { %65 = vsyncpa [#allocation5], 1 }
  0x65   :  { %66 = vsyncpa [#allocation6], 1 }

</bundles_post_ra>
